<compile_context>
chip_gen: v5e
topology: v5e:2x2
jax: 0.10.0
libtpu: 0.0.40
codegen_flags: <defaults>
</compile_context>

<pallas_src>
import functools
import math

import jax
import jax.numpy as jnp
from jax import lax
from jax.experimental import pallas as pl
from jax.experimental.pallas import tpu as pltpu

NEG_FILL = -1e9  # matches torch masked_fill_(attn_mask, -1000000000.0)


def _sdpa_kernel(q_ref, k_ref, v_ref, mask_ref, o_ref,
                 m_scr, l_scr, acc_scr, *, scale, compute_dtype):
    # q_ref    : (1, tq, D)
    # k_ref    : (1, tk, D)
    # v_ref    : (1, tk, D)
    # mask_ref : (1, tq, tk) or (1, 1, tk) integer (nonzero => masked)
    # o_ref    : (1, tq, D)
    # m_scr    : (tq, 1) f32   running row max
    # l_scr    : (tq, 1) f32   running softmax denominator
    # acc_scr  : (tq, D) f32   running (un-normalized) context accumulator
    kv_idx = pl.program_id(2)

    @pl.when(kv_idx == 0)
    def _init():
        m_scr[...] = jnp.full_like(m_scr, -jnp.inf)
        l_scr[...] = jnp.zeros_like(l_scr)
        acc_scr[...] = jnp.zeros_like(acc_scr)

    # Fold 1/sqrt(D) into Q: tq*D multiplies instead of tq*tk on the scores.
    q = (q_ref[0] * scale).astype(compute_dtype)      # (tq, D)
    k = k_ref[0].astype(compute_dtype)                 # (tk, D)
    v = v_ref[0].astype(compute_dtype)                 # (tk, D)
    msk = mask_ref[0]                                  # (tq, tk) or (1, tk)

    # Q @ K^T without materializing a transpose: contract over D of both operands.
    s = lax.dot_general(q, k,
                        dimension_numbers=(((1,), (1,)), ((), ())),
                        preferred_element_type=jnp.float32)     # (tq, tk) f32
    s = jnp.where(msk != 0, NEG_FILL, s)

    # Online-softmax update (statistics in f32).
    m_prev = m_scr[...]                                          # (tq, 1)
    m_new = jnp.maximum(m_prev, jnp.max(s, axis=-1, keepdims=True))
    alpha = jnp.exp(m_prev - m_new)                              # rescale of old stats
    p = jnp.exp(s - m_new)                                       # (tq, tk) f32

    l_scr[...] = alpha * l_scr[...] + jnp.sum(p, axis=-1, keepdims=True)
    acc_scr[...] = alpha * acc_scr[...] + jnp.dot(
        p.astype(compute_dtype), v, preferred_element_type=jnp.float32)
    m_scr[...] = m_new

    @pl.when(kv_idx == pl.num_programs(2) - 1)
    def _finalize():
        inv_l = pl.reciprocal(l_scr[...], approx=True)   # EUP slot, effectively free
        o_ref[0] = (acc_scr[...] * inv_l).astype(o_ref.dtype)


def scaled_dot_product_attention(Q, K, V, attn_mask, *,
                                 compute_dtype=jnp.bfloat16,
                                 max_tq=256, max_tk=512):
    """Q, K, V: (B, H, S, D) float32; attn_mask: bool, broadcastable to (B, H, Sq, Sk)."""
    B, H, Sq, D = Q.shape
    Sk = K.shape[2]
    BH = B * H

    # --- tile sizes: full extent for short sequences, capped otherwise -------------
    tq = Sq if Sq <= max_tq else max_tq
    tk = Sk if Sk <= max_tk else max_tk
    Sq_p = pl.cdiv(Sq, tq) * tq
    Sk_p = pl.cdiv(Sk, tk) * tk
    pad_q, pad_k = Sq_p - Sq, Sk_p - Sk

    q = Q.reshape(BH, Sq, D)
    k = K.reshape(BH, Sk, D)
    v = V.reshape(BH, Sk, D)

    # --- mask preparation -----------------------------------------------------------
    # Key-padding masks (constant over the query axis) travel as a (BH, 1, Sk) vector:
    # O(S) HBM bytes instead of O(S^2).  Dense masks use int8 when the tile shape is
    # int8-tiling friendly, int32 otherwise (tiny sequences, traffic irrelevant).
    key_only = attn_mask.ndim == 4 and attn_mask.shape[2] == 1
    if key_only:
        mask = jnp.broadcast_to(attn_mask, (B, H, 1, Sk)).reshape(BH, 1, Sk)
        mask = mask.astype(jnp.int32)
    else:
        mask = jnp.broadcast_to(attn_mask, (B, H, Sq, Sk)).reshape(BH, Sq, Sk)
        mask_dtype = jnp.int8 if (tq % 32 == 0 and tk % 128 == 0) else jnp.int32
        mask = mask.astype(mask_dtype)

    # --- pad ragged sequence lengths (padded keys are masked out) --------------------
    if pad_q or pad_k:
        q = jnp.pad(q, ((0, 0), (0, pad_q), (0, 0)))
        k = jnp.pad(k, ((0, 0), (0, pad_k), (0, 0)))
        v = jnp.pad(v, ((0, 0), (0, pad_k), (0, 0)))
        if key_only:
            mask = jnp.pad(mask, ((0, 0), (0, 0), (0, pad_k)), constant_values=1)
        else:
            mask = jnp.pad(mask, ((0, 0), (0, pad_q), (0, pad_k)), constant_values=1)

    if key_only:
        mask_spec = pl.BlockSpec((1, 1, tk), lambda b, qi, ki: (b, 0, ki))
    else:
        mask_spec = pl.BlockSpec((1, tq, tk), lambda b, qi, ki: (b, qi, ki))

    scale = 1.0 / math.sqrt(D)
    kernel = functools.partial(_sdpa_kernel, scale=scale, compute_dtype=compute_dtype)
    grid = (BH, Sq_p // tq, Sk_p // tk)

    out = pl.pallas_call(
        kernel,
        out_shape=jax.ShapeDtypeStruct((BH, Sq_p, D), Q.dtype),
        grid_spec=pltpu.PrefetchScalarGridSpec(
            num_scalar_prefetch=0,
            grid=grid,
            in_specs=[
                pl.BlockSpec((1, tq, D), lambda b, qi, ki: (b, qi, 0)),   # Q
                pl.BlockSpec((1, tk, D), lambda b, qi, ki: (b, ki, 0)),   # K
                pl.BlockSpec((1, tk, D), lambda b, qi, ki: (b, ki, 0)),   # V
                mask_spec,                                                # mask
            ],
            out_specs=pl.BlockSpec((1, tq, D), lambda b, qi, ki: (b, qi, 0)),
            scratch_shapes=[
                pltpu.VMEM((tq, 1), jnp.float32),   # running max
                pltpu.VMEM((tq, 1), jnp.float32),   # running denom
                pltpu.VMEM((tq, D), jnp.float32),   # context accumulator
            ],
        ),
        compiler_params=pltpu.CompilerParams(
            dimension_semantics=("parallel", "parallel", "arbitrary")),
    )(q, k, v, mask)

    if pad_q:
        out = out[:, :Sq, :]
    return out.reshape(B, H, Sq, D)


def reference(Q, K, V, attn_mask):
    """Plain-JAX reference matching the PyTorch forward."""
    d = Q.shape[-1]
    scores = jnp.einsum("bhqd,bhkd->bhqk", Q, K) / jnp.sqrt(jnp.float32(d))
    scores = jnp.where(attn_mask, NEG_FILL, scores)
    attn = jax.nn.softmax(scores, axis=-1)
    return jnp.einsum("bhqk,bhkd->bhqd", attn, V)


if __name__ == "__main__":
    B, H, S, D = 2, 4, 8, 32

    key = jax.random.PRNGKey(0)
    kq, kk, kv_, km, km2 = jax.random.split(key, 5)
    Q = jax.random.normal(kq, (B, H, S, D), jnp.float32)
    K = jax.random.normal(kk, (B, H, S, D), jnp.float32)
    V = jax.random.normal(kv_, (B, H, S, D), jnp.float32)

    # --- case 1: key-padding mask (vector fast path), bf16 compute -------------------
    key_pad = jax.random.bernoulli(km, 0.25, (B, 1, 1, S))
    out_bf16 = jax.block_until_ready(scaled_dot_product_attention(Q, K, V, key_pad))
    ref1 = reference(Q, K, V, key_pad)
    assert out_bf16.shape == (B, H, S, D)
    assert jnp.allclose(out_bf16, ref1, atol=5e-2, rtol=5e-2), "bf16 path mismatch"

    # same mask, f32 compute path -> tight tolerance check of kernel correctness
    out_f32 = jax.block_until_ready(
        scaled_dot_product_attention(Q, K, V, key_pad, compute_dtype=jnp.float32))
    assert jnp.allclose(out_f32, ref1, atol=5e-3, rtol=5e-3), "f32 path mismatch"

    # --- case 2: arbitrary dense mask (dense path), f32 compute ----------------------
    dense_mask = jax.random.bernoulli(km2, 0.25, (B, H, S, S))
    out_dense = jax.block_until_ready(
        scaled_dot_product_attention(Q, K, V, dense_mask, compute_dtype=jnp.float32))
    ref2 = reference(Q, K, V, dense_mask)
    assert jnp.allclose(out_dense, ref2, atol=5e-3, rtol=5e-3), "dense-mask mismatch"

    print("KERNEL_OK")
</pallas_src>

<mosaic_0001>
module attributes {stable_mosaic.version = 11 : i64} {
  func.func @_sdpa_kernel(%arg0: i32, %arg1: i32, %arg2: i32, %arg3: memref<1x8x32xf32, #tpu.memory_space<vmem>>, %arg4: memref<1x8x32xf32, #tpu.memory_space<vmem>>, %arg5: memref<1x8x32xf32, #tpu.memory_space<vmem>>, %arg6: memref<1x1x8xi32, #tpu.memory_space<vmem>>, %arg7: memref<1x8x32xf32, #tpu.memory_space<vmem>>, %arg8: memref<8x1xf32, #tpu.memory_space<vmem>>, %arg9: memref<8x1xf32, #tpu.memory_space<vmem>>, %arg10: memref<8x32xf32, #tpu.memory_space<vmem>>) attributes {dimension_semantics = [#tpu.dimension_semantics<parallel>, #tpu.dimension_semantics<parallel>, #tpu.dimension_semantics<arbitrary>], iteration_bounds = array<i64: 8, 1, 1>, scalar_prefetch = 0 : i64, scratch_operands = 3 : i64, tpu.core_type = #tpu.core_type<tc>, window_params = [{transform_indices = @transform_0, window_bounds = array<i64: 1, 8, 32>}, {transform_indices = @transform_1, window_bounds = array<i64: 1, 8, 32>}, {transform_indices = @transform_2, window_bounds = array<i64: 1, 8, 32>}, {transform_indices = @transform_3, window_bounds = array<i64: 1, 1, 8>}, {transform_indices = @transform_4, window_bounds = array<i64: 1, 8, 32>}]} {
    %c0_i32 = arith.constant 0 : i32
    %0 = arith.cmpi eq, %arg2, %c0_i32 : i32
    %1 = arith.extui %0 : i1 to i32
    %c0_i32_0 = arith.constant 0 : i32
    %2 = arith.cmpi ne, %1, %c0_i32_0 : i32
    scf.if %2 {
      %cst_32 = arith.constant 0xFF800000 : f32
      %49 = vector.broadcast %cst_32 : f32 to vector<8x1xf32>
      %c0_33 = arith.constant 0 : index
      %c0_34 = arith.constant 0 : index
      %50 = vector.load %arg8[%c0_33, %c0_34] : memref<8x1xf32, #tpu.memory_space<vmem>>, vector<8x1xf32>
      tpu.vector_store %arg8[%c0_33, %c0_34], %49 {strides = array<i32>} : memref<8x1xf32, #tpu.memory_space<vmem>>, vector<8x1xf32>,
      %cst_35 = arith.constant 0.000000e+00 : f32
      %51 = vector.broadcast %cst_35 : f32 to vector<8x1xf32>
      %c0_36 = arith.constant 0 : index
      %c0_37 = arith.constant 0 : index
      %52 = vector.load %arg9[%c0_36, %c0_37] : memref<8x1xf32, #tpu.memory_space<vmem>>, vector<8x1xf32>
      tpu.vector_store %arg9[%c0_36, %c0_37], %51 {strides = array<i32>} : memref<8x1xf32, #tpu.memory_space<vmem>>, vector<8x1xf32>,
      %cst_38 = arith.constant 0.000000e+00 : f32
      %53 = vector.broadcast %cst_38 : f32 to vector<8x32xf32>
      %c0_39 = arith.constant 0 : index
      %c0_40 = arith.constant 0 : index
      %54 = vector.load %arg10[%c0_39, %c0_40] : memref<8x32xf32, #tpu.memory_space<vmem>>, vector<8x32xf32>
      tpu.vector_store %arg10[%c0_39, %c0_40], %53 {strides = array<i32>} : memref<8x32xf32, #tpu.memory_space<vmem>>, vector<8x32xf32>,
    } else {
    }
    %c0 = arith.constant 0 : index
    %c0_1 = arith.constant 0 : index
    %c0_2 = arith.constant 0 : index
    %3 = vector.load %arg3[%c0, %c0_1, %c0_2] : memref<1x8x32xf32, #tpu.memory_space<vmem>>, vector<1x8x32xf32>
    %4 = vector.shape_cast %3 : vector<1x8x32xf32> to vector<8x32xf32>
    %cst = arith.constant 0.176776692 : f32
    %5 = vector.broadcast %cst : f32 to vector<8x32xf32>
    %6 = arith.mulf %4, %5 : vector<8x32xf32>
    %7 = arith.truncf %6 : vector<8x32xf32> to vector<8x32xbf16>
    %c0_3 = arith.constant 0 : index
    %c0_4 = arith.constant 0 : index
    %c0_5 = arith.constant 0 : index
    %8 = vector.load %arg4[%c0_3, %c0_4, %c0_5] : memref<1x8x32xf32, #tpu.memory_space<vmem>>, vector<1x8x32xf32>
    %9 = vector.shape_cast %8 : vector<1x8x32xf32> to vector<8x32xf32>
    %10 = arith.truncf %9 : vector<8x32xf32> to vector<8x32xbf16>
    %c0_6 = arith.constant 0 : index
    %c0_7 = arith.constant 0 : index
    %c0_8 = arith.constant 0 : index
    %11 = vector.load %arg5[%c0_6, %c0_7, %c0_8] : memref<1x8x32xf32, #tpu.memory_space<vmem>>, vector<1x8x32xf32>
    %12 = vector.shape_cast %11 : vector<1x8x32xf32> to vector<8x32xf32>
    %13 = arith.truncf %12 : vector<8x32xf32> to vector<8x32xbf16>
    %c0_9 = arith.constant 0 : index
    %c0_10 = arith.constant 0 : index
    %c0_11 = arith.constant 0 : index
    %14 = vector.load %arg6[%c0_9, %c0_10, %c0_11] : memref<1x1x8xi32, #tpu.memory_space<vmem>>, vector<1x1x8xi32>
    %15 = vector.shape_cast %14 : vector<1x1x8xi32> to vector<1x8xi32>
    %cst_12 = arith.constant dense<0.000000e+00> : vector<8x8xf32>
    %16 = tpu.matmul %7, %10, %cst_12 {dimension_numbers = #tpu.dot_dimension_numbers<[1], [1], [0], [0], [0, 0, 1, 0], [], []>} : vector<8x32xbf16>, vector<8x32xbf16>, vector<8x8xf32> -> vector<8x8xf32>
    %c0_i32_13 = arith.constant 0 : i32
    %17 = vector.broadcast %c0_i32_13 : i32 to vector<1x8xi32>
    %18 = arith.cmpi ne, %15, %17 : vector<1x8xi32>
    %cst_14 = arith.constant -1.000000e+09 : f32
    %19 = vector.shape_cast %18 : vector<1x8xi1> to vector<1x8xi1>
    %20 = vector.broadcast %19 : vector<1x8xi1> to vector<8x8xi1>
    %21 = vector.broadcast %cst_14 : f32 to vector<8x8xf32>
    %22 = arith.select %20, %21, %16 : vector<8x8xi1>, vector<8x8xf32>
    %c0_15 = arith.constant 0 : index
    %c0_16 = arith.constant 0 : index
    %23 = vector.load %arg8[%c0_15, %c0_16] : memref<8x1xf32, #tpu.memory_space<vmem>>, vector<8x1xf32>
    %cst_17 = arith.constant dense<0xFF800000> : vector<8xf32>
    %24 = vector.multi_reduction <maximumf>, %22, %cst_17 [1] : vector<8x8xf32> to vector<8xf32>
    %25 = vector.shape_cast %24 : vector<8xf32> to vector<8x1xf32>
    %26 = arith.maximumf %23, %25 : vector<8x1xf32>
    %27 = arith.subf %23, %26 : vector<8x1xf32>
    %28 = math.exp %27 : vector<8x1xf32>
    %29 = vector.broadcast %26 : vector<8x1xf32> to vector<8x8xf32>
    %30 = arith.subf %22, %29 : vector<8x8xf32>
    %31 = math.exp %30 : vector<8x8xf32>
    %c0_18 = arith.constant 0 : index
    %c0_19 = arith.constant 0 : index
    %32 = vector.load %arg9[%c0_18, %c0_19] : memref<8x1xf32, #tpu.memory_space<vmem>>, vector<8x1xf32>
    %33 = arith.mulf %28, %32 : vector<8x1xf32>
    %cst_20 = arith.constant dense<0.000000e+00> : vector<8xf32>
    %34 = vector.multi_reduction <add>, %31, %cst_20 [1] : vector<8x8xf32> to vector<8xf32>
    %35 = vector.shape_cast %34 : vector<8xf32> to vector<8x1xf32>
    %36 = arith.addf %33, %35 : vector<8x1xf32>
    %c0_21 = arith.constant 0 : index
    %c0_22 = arith.constant 0 : index
    %37 = vector.load %arg9[%c0_21, %c0_22] : memref<8x1xf32, #tpu.memory_space<vmem>>, vector<8x1xf32>
    tpu.vector_store %arg9[%c0_21, %c0_22], %36 {strides = array<i32>} : memref<8x1xf32, #tpu.memory_space<vmem>>, vector<8x1xf32>,
    %c0_23 = arith.constant 0 : index
    %c0_24 = arith.constant 0 : index
    %38 = vector.load %arg10[%c0_23, %c0_24] : memref<8x32xf32, #tpu.memory_space<vmem>>, vector<8x32xf32>
    %39 = vector.broadcast %28 : vector<8x1xf32> to vector<8x32xf32>
    %40 = arith.mulf %39, %38 : vector<8x32xf32>
    %41 = arith.truncf %31 : vector<8x8xf32> to vector<8x8xbf16>
    %cst_25 = arith.constant dense<0.000000e+00> : vector<8x32xf32>
    %42 = tpu.matmul %41, %13, %cst_25 {dimension_numbers = #tpu.dot_dimension_numbers<[1], [0], [0], [1], [0, 0, 1, 1], [], []>} : vector<8x8xbf16>, vector<8x32xbf16>, vector<8x32xf32> -> vector<8x32xf32>
    %43 = arith.addf %40, %42 : vector<8x32xf32>
    %c0_26 = arith.constant 0 : index
    %c0_27 = arith.constant 0 : index
    %44 = vector.load %arg10[%c0_26, %c0_27] : memref<8x32xf32, #tpu.memory_space<vmem>>, vector<8x32xf32>
    tpu.vector_store %arg10[%c0_26, %c0_27], %43 {strides = array<i32>} : memref<8x32xf32, #tpu.memory_space<vmem>>, vector<8x32xf32>,
    %c0_28 = arith.constant 0 : index
    %c0_29 = arith.constant 0 : index
    %45 = vector.load %arg8[%c0_28, %c0_29] : memref<8x1xf32, #tpu.memory_space<vmem>>, vector<8x1xf32>
    tpu.vector_store %arg8[%c0_28, %c0_29], %26 {strides = array<i32>} : memref<8x1xf32, #tpu.memory_space<vmem>>, vector<8x1xf32>,
    %c0_i32_30 = arith.constant 0 : i32
    %46 = arith.cmpi eq, %arg2, %c0_i32_30 : i32
    %47 = arith.extui %46 : i1 to i32
    %c0_i32_31 = arith.constant 0 : i32
    %48 = arith.cmpi ne, %47, %c0_i32_31 : i32
    scf.if %48 {
      %c0_32 = arith.constant 0 : index
      %c0_33 = arith.constant 0 : index
      %49 = vector.load %arg9[%c0_32, %c0_33] : memref<8x1xf32, #tpu.memory_space<vmem>>, vector<8x1xf32>
      %50 = tpu.reciprocal %49 {approx = true} : vector<8x1xf32> -> vector<8x1xf32>
      %c0_34 = arith.constant 0 : index
      %c0_35 = arith.constant 0 : index
      %51 = vector.load %arg10[%c0_34, %c0_35] : memref<8x32xf32, #tpu.memory_space<vmem>>, vector<8x32xf32>
      %52 = vector.broadcast %50 : vector<8x1xf32> to vector<8x32xf32>
      %53 = arith.mulf %51, %52 : vector<8x32xf32>
      %c0_36 = arith.constant 0 : index
      %c0_37 = arith.constant 0 : index
      %c0_38 = arith.constant 0 : index
      %54 = vector.load %arg7[%c0_36, %c0_37, %c0_38] : memref<1x8x32xf32, #tpu.memory_space<vmem>>, vector<1x8x32xf32>
      %55 = vector.shape_cast %54 : vector<1x8x32xf32> to vector<8x32xf32>
      %56 = vector.shape_cast %53 : vector<8x32xf32> to vector<1x8x32xf32>
      tpu.vector_store %arg7[%c0_36, %c0_37, %c0_38], %56 {strides = array<i32>} : memref<1x8x32xf32, #tpu.memory_space<vmem>>, vector<1x8x32xf32>,
    } else {
    }
    return
  }
  func.func @transform_0(%arg0: i32, %arg1: i32, %arg2: i32) -> (i32, i32, i32) {
    %c0_i32 = arith.constant 0 : i32
    %c0_i32_0 = arith.constant 0 : i32
    return %arg0, %arg1, %c0_i32 : i32, i32, i32
  }
  func.func @transform_1(%arg0: i32, %arg1: i32, %arg2: i32) -> (i32, i32, i32) {
    %c0_i32 = arith.constant 0 : i32
    %c0_i32_0 = arith.constant 0 : i32
    return %arg0, %arg2, %c0_i32 : i32, i32, i32
  }
  func.func @transform_2(%arg0: i32, %arg1: i32, %arg2: i32) -> (i32, i32, i32) {
    %c0_i32 = arith.constant 0 : i32
    %c0_i32_0 = arith.constant 0 : i32
    return %arg0, %arg2, %c0_i32 : i32, i32, i32
  }
  func.func @transform_3(%arg0: i32, %arg1: i32, %arg2: i32) -> (i32, i32, i32) {
    %c0_i32 = arith.constant 0 : i32
    %c0_i32_0 = arith.constant 0 : i32
    return %arg0, %c0_i32, %arg2 : i32, i32, i32
  }
  func.func @transform_4(%arg0: i32, %arg1: i32, %arg2: i32) -> (i32, i32, i32) {
    %c0_i32 = arith.constant 0 : i32
    %c0_i32_0 = arith.constant 0 : i32
    return %arg0, %arg1, %c0_i32 : i32, i32, i32
  }
}

</mosaic_0001>

<bundles_post_ra>
// kernel: tpu_custom_call.1
= control target key start
LH: loop header
LB: loop body
LE: loop exit
PB: predicated region body
PF: predicated region fallthrough
CT: control target
= control target key end

     0   :  { %s1173_s0 = inlined_call_operand.hbm [shape: f32[8,8,32], index: 0, kind: input, shape index: {}]   ;;  %s1174_s1 = inlined_call_operand.hbm [shape: f32[8,8,32], index: 1, kind: input, shape index: {}]   ;;  %s1175_s2 = inlined_call_operand.hbm [shape: f32[8,8,32], index: 2, kind: input, shape index: {}]   ;;  %s1176_s3 = inlined_call_operand.hbm [shape: s32[8,1,8], index: 3, kind: input, shape index: {}]   ;;  %s1177_s4 = inlined_call_operand.hbm [shape: f32[8,8,32], index: 4, kind: output, shape index: {}]  }
   0x1   :  { %1182 = sst [smem:[#allocation23_spill]] %s1173_s0 }
   0x2   :  { %1183 = sst [smem:[#allocation24_spill]] %s1174_s1 }
   0x3   :  { %9 = vsyncpa [#allocation6], 0 }
   0x4   :  { %11 = vsyncpa [#allocation6 + $0x1], 0 }
   0x5   :  { %12 = vsyncpa [#allocation9], 0 }
   0x6   :  { %14 = vsyncpa [#allocation9 + $0x1], 0 }
   0x7   :  { %15 = vsyncpa [#allocation12], 0 }
   0x8   :  { %17 = vsyncpa [#allocation12 + $0x1], 0 }
   0x9   :  { %18 = vsyncpa [#allocation7], 0 }
   0xa   :  { %20 = vsyncpa [#allocation7 + $0x1], 0  ;;  %s985_s15 = smov 0   ;;  %s987_s16 = smov 0  }
   0xb   :  { %s989_s17 = smov 0   ;;  %s991_s18 = smov 0  }
   0xc   :  { %s993_s19 = smov 0   ;;  %s995_s20 = smov 0  }
   0xd LB: > { %1184 = sst [smem:[#allocation18_spill]] %s935_s15  ;;  %s1016_s21 = sadd.s32 4294967295, %s955_s20   ;;  %s955_s20 = sphi %s995_s20, %s26_s20   ;;  %s951_s19 = sphi %s993_s19, %s1205_s19   ;;  %s947_s18 = sphi %s991_s18, %s1204_s18   ;;  %s943_s17 = sphi %s989_s17, %s1200_s17   ;;  %s939_s16 = sphi %s987_s16, %s1203_s16   ;;  %s935_s15 = sphi %s985_s15, %s1202_s15  }
   0xe   : > { %1185 = sst [smem:[#allocation19_spill]] %s943_s17  ;;  %s636_s22 = sadd.s32 4294967294, %s955_s20  }
   0xf   : > { %s45_s23 = sadd.s32 1, %s951_s19  ;;  %s54_s24 = sadd.s32 1, %s943_s17 }
  0x10   : > { %p47_p0 = scmp.ge.s32.totalorder %s45_s23, 8  ;;  %p61_p1 = scmp.ne.s32.totalorder %s943_s17, %s939_s16 }
  0x11   : > { %p62_p2 = scmp.eq.s32.totalorder %s955_s20, 0  ;;  %p67_p3 = scmp.ne.s32.totalorder %s939_s16, %s935_s15 }
  0x12   : > { %s1207_s23 = smov (%p47_p0, %s45_s23), 0  ;;  %p68_p5 = scmp.eq.s32.totalorder %s1016_s21, 0 }
  0x13   : > { %1186 = sst [smem:[#allocation20_spill]] %s1207_s23  ;;  %p1028_p4 = por %p62_p2, %p61_p1 }
  0x14   : > { %s49_s26 = ssub.s32 %s951_s19, %s1207_s23  ;;  %p177_p6 = scmp.eq.s32.totalorder %s1016_s21, 7 }
  0x15   : > { %p52_p7 = scmp.eq.s32.totalorder %s49_s26, 0  ;;  %p1036_p8 = por %p68_p5, %p67_p3 }
  0x16   : > { %p1040_p9 = por %p177_p6, %p61_p1  ;;  %p183_p10 = scmp.eq.s32.totalorder %s636_s22, 7 }
  0x17   : > { %s1045_s29 = scalar_select %p52_p7, %s943_s17, %s54_s24  }
  0x18   : > { %p1047_p11 = por %p183_p10, %p67_p3  ;;  %p683_p12 = scmp.lt.s32.totalorder %s955_s20, 8 }
  0x19   : > { %1190 = sst [smem:[#allocation21_spill]] %s1045_s29  ;;  %s1053_s5 = sand.u32 1, %s943_s17  }
  0x1a   : > { %s1191_s30 = scalar_select %p1047_p11, 1, 0 }
  0x1b   : > { %s639_s6 = sshll.u32 %s1053_s5, 3  ;;  %s640_s7 = sshll.u32 %s951_s19, 3 }
  0x1c   : > { %1192 = sst [smem:[#allocation22_spill]] %s1191_s30  ;;  %p1059_p13 = pnand %p683_p12, %p1028_p4 }
  0x1d   : > { %s223_s9 = sand.u32 1, %s955_s20   ;;  %s1194_s1 = sld [smem:[#allocation24_spill]] }
  0x1e   : > { %s227_s14 = scalar_lea.vmem [#allocation8], %s639_s6  ;;  %s224_s24 = scalar_lea.sflag [#allocation9], %s223_s9 }
  0x1f   : > { %s236_s22 = sshll.u32 %s227_s14, 4  ;;  %p645_p0 = scmp.ge.s32.totalorder %s955_s20, 1  ;;  %s237_s22 = int_to_ptr.vmem [resolvable:$true] %s236_s22 }
  0x20   : > { %p279_p1 = scmp.lt.s32.totalorder %s955_s20, 9  ;;  %s1196_s0 = sld [smem:[#allocation23_spill]] }
  0x21   : > { %s207_s14 = scalar_lea.vmem [#allocation5], %s639_s6  ;;  %s204_s9 = scalar_lea.sflag [#allocation6], %s1053_s5 }
  0x22   : > { %p1071_p2 = pnand %p645_p0, %p279_p1  ;;  %s252_s23 = scalar_lea.hbm %s1175_s2, %s640_s7 }
  0x23   : > { %s232_s12 = scalar_lea.hbm %s1194_s1, %s640_s7  ;;  %s216_s1 = sshll.u32 %s207_s14, 4  ;;  %s217_s1 = int_to_ptr.vmem [resolvable:$true] %s216_s1 }
  0x24   : > { %s234_s13 = sshll.u32 %s232_s12, 4  ;;  %s254_s29 = sshll.u32 %s252_s23, 4  ;;  %s235_s13 = int_to_ptr.hbm [resolvable:$true] %s234_s13  ;;  %s255_s29 = int_to_ptr.hbm [resolvable:$true] %s254_s29 }
  0x25   : > { %672 = dma.hbm_to_vmem [thread:$0]  (!%p1059_p13), %s235_s13, 128, %s237_s22, %s224_s24  }
  0x26   : > { %s212_s11 = scalar_lea.hbm %s1196_s0, %s640_s7  ;;  %s247_s17 = scalar_lea.vmem [#allocation10], %s639_s6 }
  0x27   : > { %s214_s12 = sshll.u32 %s212_s11, 4  ;;  %s256_s26 = sshll.u32 %s247_s17, 4  ;;  %s215_s12 = int_to_ptr.hbm [resolvable:$true] %s214_s12  ;;  %s257_s26 = int_to_ptr.vmem [resolvable:$true] %s256_s26 }
  0x28   : > { %669 = dma.hbm_to_vmem [thread:$0]  (!%p1059_p13), %s215_s12, 128, %s217_s1, %s204_s9  }
  0x29   : > { %675 = dma.hbm_to_vmem [thread:$0]  (!%p1059_p13), %s255_s29, 128, %s257_s26, %s224_s24  }
  0x2a   : > { %s270_s14 = scalar_lea.hbm %s1176_s3, %s951_s19  ;;  %s266_s0 = scalar_lea.vmem [#allocation11], %s1053_s5 }
  0x2b   : > { %s274_s30 = sshll.u32 %s266_s0, 4  ;;  %s272_s15 = sshll.u32 %s270_s14, 4  ;;  %s275_s30 = int_to_ptr.vmem [resolvable:$true] %s274_s30  ;;  %s273_s15 = int_to_ptr.hbm [resolvable:$true] %s272_s15 }
  0x2c   : > { %s264_s1 = scalar_lea.sflag [#allocation12], %s1053_s5  ;;  %283 = sbr.rel (%p1071_p2) target bundleno = 669 (0x29d), region = 36 }
  0x2d   : > { %678 = dma.hbm_to_vmem [thread:$0]  (!%p1059_p13), %s273_s15, 16, %s275_s30, %s264_s1  }
  0x2e   : > { %s1097_s17 = sand.u32 (!%p1071_p2), 1, %s939_s16  }
  0x2f   : > { %s1100_s23 = sshll.u32 (!%p1071_p2), %s1097_s17, 3  ;;  %s286_s29 = scalar_lea.sflag (!%p1071_p2), [#allocation6], %s1097_s17 }
  0x30   : > { %s289_s0 = scalar_lea.vmem (!%p1071_p2), [#allocation5], %s1100_s23 }
  0x31   : > { %918 = dma.done.wait (%p1036_p8), %s286_s29, 128  }
  0x32   : > { %920 = vsyncadd (%p1036_p8), %s286_s29, 4294967168  ;;  %s295_s15 = sand.u32 1, %s1016_s21   ;;  %s299_s5 = scalar_lea.vmem [#allocation8], %s1100_s23 }
  0x33   : > { %s296_s30 = scalar_lea.sflag [#allocation9], %s295_s15 }
  0x34   : > { %922 = dma.done.wait (%p1036_p8), %s296_s30, 256  }
  0x35   : > { %924 = vsyncadd (%p1036_p8), %s296_s30, 4294967040  ;;  %s309_s6 = scalar_lea.vmem [#allocation10], %s1100_s23  ;;  %s316_s7 = scalar_lea.sflag [#allocation12], %s1097_s17 }
  0x36   : > { %s318_s8 = scalar_lea.vmem [#allocation11], %s1097_s17 }
  0x37   : > { %926 = dma.done.wait (%p1036_p8), %s316_s7, 16  }
  0x38   : > { %928 = vsyncadd (%p1036_p8), %s316_s7, 4294967280  ;;  %vm366_vm0 = vcmask 261120   ;;  %v957_v0 = vmov 0.0   ;;  %v371_v1 = vld [vmem:[%s299_s5] sm:$0xff]  ;;  %v368_v2 = vld [vmem:[%s289_s0] sm:$0xff]  ;;  %v958_v7 = vmov 0  }
  0x39   : > { %367 = vst.msk [vmem:[#allocation4] sm:$0xff] %vm366_vm0, %v957_v0  ;;  %v372_v3 = vpack.c.bf16 %v371_v1, %v371_v1  ;;  %v369_v5 = vmul.f32 0.17677669, %v368_v2  ;;  %736 = vset.pattern.permute.xlu0 %v958_v7  ;;  %737 = vset.pattern.permute.xlu1 %v958_v7  ;;  %vm363_vm1 = vcmask 7168   ;;  %v959_v8 = vmov -inf   ;;  %v373_v20 = vld [vmem:[%s309_s6] sm:$0xff] }
  0x3a   : > { %738 = vset.pattern.permute.xlu2 %v958_v7  ;;  %364 = vst.msk [vmem:[#allocation2] sm:$0xff] %vm363_vm1, %v959_v8  ;;  %v375_v9 = vld [vmem:[%s318_s8] sm:$0x1]  ;;  %vm402_vm4 = vcmask 64512   ;;  %vm437_vm5 = vcmask 1043456   ;;  %v374_v21 = vpack.c.bf16 %v373_v20, %v373_v20  ;;  %s653_s21 = sshll.u32 %s947_s18, 3 }
  0x3b   : > { %v381_v4 = vsel %vm366_vm0, %v372_v3, 0  ;;  %v370_v6 = vpack.c.bf16 %v369_v5, %v369_v5  ;;  %365 = vst.msk [vmem:[#allocation3] sm:$0xff] %vm363_vm1, %v957_v0  ;;  %vm396_vm2 = vcmp.ne.s32.totalorder %v375_v9, 0  ;;  %s482_s25 = scalar_lea.hbm %s1177_s4, %s653_s21  ;;  %s357_s12 = scalar_lea.vmem [#allocation13], %s1100_s23 }
  0x3c   : > { %390 = vmatpush.bf16.xpose.msra.mxu0 %v381_v4  ;;  %v397_v10 = vsel %vm396_vm2, 1, %v958_v7  ;;  %v439_v22 = vsel %vm437_vm5, %v374_v21, 0  ;;  %s484_s9 = sshll.u32 %s357_s12, 4  ;;  %s486_s13 = sshll.u32 %s482_s25, 4  ;;  %s485_s9 = int_to_ptr.vmem [resolvable:$true] %s484_s9  ;;  %s487_s13 = int_to_ptr.hbm [resolvable:$true] %s486_s13 }
  0x3d   : > { %v398_v11 = vperm.slane %v397_v10, 0  ;;  %448 = vmatpush.bf16.msra.mxu1 %v439_v22  ;;  %s471_s22 = scalar_lea.sflag [#allocation7], %s1097_s17  ;;  %s879_s26 = sshra.s32 %s487_s13, 4  ;;  %s880_s26 = int_to_ptr.hbm [resolvable:$true] %s879_s26 }
  0x3e   : > { %s881_s10 = scalar_lea.hbm %s880_s26, 8  ;;  %s885_s14 = scalar_lea.hbm %s1177_s4, 64 }
  0x3f   : > { %vm399_vm3 = vcmp.eq.s32.totalorder %v398_v11, 1  ;;  %p882_p3 = scmp.ne.s32.totalorder %s880_s26, %s881_s10  ;;  %p886_p6 = scmp.lt.s32.totalorder %s880_s26, %s1177_s4 }
  0x40   : > { %v426_v39 = vld [vmem:[#allocation4] sm:$0xff]  ;;  %p887_p7 = scmp.lt.s32.totalorder %s885_s14, %s881_s10 }
  0x41   : > { %v401_v16 = vld [vmem:[#allocation2] sm:$0xff]  ;;  %p883_p4 = pnand %p882_p3, %p1040_p9 }
  0x42   : > { %v418_v31 = vld [vmem:[#allocation3] sm:$0xff]  ;;  %p888_p8 = por %p887_p7, %p886_p6 }
  0x43   : > { %650 = vmatmul.msk.bf16.vlgmr.msra.gmra.mxu0 %vm366_vm0, %v370_v6  ;;  %p884_p5 = pneg %p883_p4 }
  0x45   : > { %p889_p10 = pnand %p888_p8, %p884_p5 }
  0xc0   : > { %v392_v12 = vpop.f32.mrf.mxu0 }
  0xc1   : > { %v400_v13 = vsel %vm399_vm3, -1e+09, %v392_v12 }
  0xc2   : > { %v403_v14 = vsel %vm402_vm4, %v400_v13, -inf }
  0xc3   : > { %404 = vmax.xlane.f32.xlu0 %v403_v14 }
  0xc8   : > { %v394_v15 = vpop.f32.mrf.mxu0 }
 0x136   : > { %v405_v17 = vpop.xlane.xlu0 %404 }
 0x137   : > { %v406_v18 = vmax.f32 %v401_v16, %v405_v17 }
 0x139   : > { %v407_v19 = vsub.f32 %v401_v16, %v406_v18  ;;  %456 = vst.msk [vmem:[#allocation2] sm:$0xff] %vm363_vm1, %v406_v18  ;;  %412 = vperm.xlu0 %736, %v406_v18  }
 0x13b   : > { %v408_v29 = vmul.f32 1.442695, %v407_v19 }
 0x1ab   : > { %v413_v23 = vpop.permute.xlu0 %412 }
 0x1ac   : > { %v415_v24 = vsub.f32 %v400_v13, %v413_v23 }
 0x1ae   : > { %v416_v25 = vmul.f32 1.442695, %v415_v24 }
 0x1b0   : > { %739 = vpow2.f32 %v416_v25 }
 0x1b1   : > { %741 = vpow2.f32 %v408_v29 }
 0x1b6   : > { %v740_v26 = vpop.eup %739 }
 0x1b7   : > { %v420_v27 = vsel %vm402_vm4, %v740_v26, 0.0  ;;  %v433_v28 = vpack.c.bf16 %v740_v26, %v740_v26  ;;  %v742_v30 = vpop.eup %741 }
 0x1b8   : > { %421 = vadd.xlane.f32.xlu1 %v420_v27  ;;  %v419_v32 = vmul.f32 %v742_v30, %v418_v31 }
 0x1b9   : > { %651 = vmatmul.msk.bf16.vlgmr.msra.gmra.mxu1 %vm402_vm4, %v433_v28 }
 0x1d1   : > { %429 = vperm.xlu1 %737, %v742_v30  }
 0x22b   : > { %v422_v33 = vpop.xlane.xlu1 %421 }
 0x22c   : > { %v423_v34 = vadd.f32 %v422_v33, %v419_v32 }
 0x22e   : > { %425 = vst.msk [vmem:[#allocation3] sm:$0xff] %vm363_vm1, %v423_v34 }
 0x235   : > { %v460_v35 = vld [vmem:[#allocation3] sm:$0xff] }
 0x236   : > { %v450_v36 = vpop.f32.mrf.mxu1  ;;  %743 = vrcp.f32 %v460_v35 }
 0x23c   : > { %v744_v37 = vpop.eup %743 }
 0x23d   : > { %465 = vperm.xlu2 %738, %v744_v37  }
 0x23e   : > { %v452_v38 = vpop.f32.mrf.mxu1 }
 0x243   : > { %v430_v40 = vpop.permute.xlu1 %429 }
 0x244   : > { %v432_v41 = vmul.f32 %v430_v40, %v426_v39 }
 0x246   : > { %v454_v42 = vadd.f32 %v450_v36, %v432_v41 }
 0x248   : > { %455 = vst.msk [vmem:[#allocation4] sm:$0xff] %vm366_vm0, %v454_v42 }
 0x24f   : > { %v462_v43 = vld [vmem:[#allocation4] sm:$0xff] }
 0x297   : > { %v466_v44 = vpop.permute.xlu2 %465 }
 0x298   : > { %v468_v45 = vmul.f32 %v466_v44, %v462_v43 }
 0x29a   : > { %469 = vst.msk [vmem:[%s357_s12] sm:$0xff] %vm366_vm0, %v468_v45 }
 0x29b   : > { %892 = shalt.err (!%p889_p10)
}
 0x29c   : > { %664 = dma.vmem_to_hbm [thread:$0]  (%p1040_p9), %s485_s9, 128, %s487_s13, %s471_s22  }
 0x29d PF: > { %s1197_s17 = sld [smem:[#allocation18_spill]]  ;;  %p684_p12 = scmp.ge.s32.totalorder %s955_s20, 2 }
 0x29f   : > { %p680_p13 = pnand %p684_p12, %p1047_p11 }
 0x2a1   : > { %p681_p0 = pneg %p680_p13 }
 0x2a3   : > { %s498_s0 = sand.u32 1, %s1197_s17  }
 0x2a4   : > { %s499_s15 = scalar_lea.sflag [#allocation7], %s498_s0 }
 0x2a5   : > { %930 = dma.done.wait (%p681_p0), %s499_s15, 128  }
 0x2a6   : > { %932 = vsyncadd (%p681_p0), %s499_s15, 4294967168  ;;  %s26_s20 = sadd.s32 1, %s955_s20   ;;  %s1199_s30 = sld [smem:[#allocation19_spill]] }
 0x2a7   : > { %p23_p1 = scmp.ge.s32.totalorder %s26_s20, 10   ;;  %s1200_s17 = sld [smem:[#allocation21_spill]] }
 0x2a8   : > { %s1201_s28 = sld [smem:[#allocation20_spill]]  ;;  %s1202_s15 = smov %s939_s16 }
 0x2a9   : > { %s1204_s18 = smov %s951_s19 }
 0x2aa   :  { %25 = sbr.rel (!%p23_p1) target bundleno = 13 (0xd), region = 126 }
 0x2ac   : > { %s1203_s16 = smov %s1199_s30 }
 0x2ae   : > { %s1205_s19 = smov %s1201_s28 }
 0x2af   :  { %505 = vsyncpa [#allocation6], 1 }
 0x2b0   :  { %507 = vsyncpa [#allocation6 + $0x1], 1 }
 0x2b1   :  { %508 = vsyncpa [#allocation9], 1 }
 0x2b2   :  { %510 = vsyncpa [#allocation9 + $0x1], 1 }
 0x2b3   :  { %511 = vsyncpa [#allocation12], 1 }
 0x2b4   :  { %513 = vsyncpa [#allocation12 + $0x1], 1 }
 0x2b5   :  { %514 = vsyncpa [#allocation7], 1 }
 0x2b6   :  { %516 = vsyncpa [#allocation7 + $0x1], 1 }

</bundles_post_ra>
